<compile_context>
chip_gen: v7x
topology: tpu7x:2x2x1
jax: 0.10.0
libtpu: 0.0.40
codegen_flags: <defaults>
</compile_context>

<pallas_src>
import functools

import jax
import jax.numpy as jnp
from jax.experimental import pallas as pl
from jax.experimental.pallas import tpu as pltpu


def mm_times8_kernel(a_ref, b_ref, o_ref):
    """One (tm, tn) output tile of 8 * (x @ x), accumulated over the k grid axis."""
    k = pl.program_id(2)
    nk = pl.num_programs(2)

    prod = jnp.dot(a_ref[...], b_ref[...], preferred_element_type=jnp.float32)

    @pl.when(k == 0)
    def _():
        # First k step: plain store (saves a full-tile zero-store + reload).
        o_ref[...] = prod

    @pl.when(k > 0)
    def _():
        o_ref[...] += prod

    @pl.when(k == nk - 1)
    def _():
        # The PyTorch add-chain t1..t10 is algebraically 8 * (x @ x).
        o_ref[...] = o_ref[...] * jnp.float32(8.0)


def _largest_tile(n, quantum, cap):
    """Largest multiple of `quantum` that divides `n` and is <= cap (quantum | n)."""
    best = quantum
    d = quantum
    top = min(cap, n)
    while d <= top:
        if n % d == 0:
            best = d
        d += quantum
    return best


def _choose_tiles(np_size):
    """Pick (tm, tn, tk) for the (possibly padded) square size `np_size`.

    Constraints: tm multiple of 8, tn/tk multiples of 128 (or equal to the full
    dim), and each must divide np_size exactly (no partial k blocks).
    """
    if np_size <= 256:
        # Single full-array block; legal for any size, no padding required.
        return np_size, np_size, np_size
    if np_size <= 1024:
        # np_size is a multiple of 128 here -> np_size//2 is a multiple of 64.
        # Two i-blocks so both v7x TensorCores get work ("parallel" m axis).
        return np_size // 2, np_size, np_size
    # Large N: biggest tiles (<=1024 output edge, <=512 k panel) dividing np_size.
    tm = _largest_tile(np_size, 8, 1024)
    tn = _largest_tile(np_size, 128, 1024)
    tk = _largest_tile(np_size, 128, 512)
    return tm, tn, tk


@functools.partial(jax.jit, static_argnames=("tm", "tn", "tk"))
def _mm_times8_call(xp, *, tm, tn, tk):
    np_size = xp.shape[0]
    gm, gn, gk = np_size // tm, np_size // tn, np_size // tk
    in_bytes = jnp.dtype(xp.dtype).itemsize

    cost = pl.CostEstimate(
        flops=2 * np_size * np_size * np_size + np_size * np_size,
        transcendentals=0,
        bytes_accessed=in_bytes * np_size * np_size * (gm + gn)
        + 4 * np_size * np_size,
    )

    return pl.pallas_call(
        mm_times8_kernel,
        out_shape=jax.ShapeDtypeStruct((np_size, np_size), jnp.float32),
        grid_spec=pltpu.PrefetchScalarGridSpec(
            num_scalar_prefetch=0,
            grid=(gm, gn, gk),
            in_specs=[
                pl.BlockSpec((tm, tk), lambda i, j, k: (i, k)),
                pl.BlockSpec((tk, tn), lambda i, j, k: (k, j)),
            ],
            out_specs=pl.BlockSpec((tm, tn), lambda i, j, k: (i, j)),
        ),
        compiler_params=pltpu.CompilerParams(
            dimension_semantics=("parallel", "parallel", "arbitrary"),
        ),
        cost_estimate=cost,
    )(xp, xp)


def model_forward(x, *, use_bf16=False):
    """Equivalent of Model.forward(x) == 8 * (x @ x) for a square matrix x."""
    n, k = x.shape
    assert n == k, "torch.mm(x, x) requires a square matrix"
    x = x.astype(jnp.float32)

    if n <= 256:
        np_size = n                              # single full-array block, no pad
    else:
        np_size = ((n + 127) // 128) * 128       # pad only to the next lane multiple

    tm, tn, tk = _choose_tiles(np_size)

    in_dtype = jnp.bfloat16 if use_bf16 else jnp.float32
    xp = x.astype(in_dtype)
    if np_size != n:
        # Single fused Pad op; zero rows/cols contribute nothing to the product,
        # so slicing the result back is exact.
        xp = jnp.pad(xp, ((0, np_size - n), (0, np_size - n)))

    out = _mm_times8_call(xp, tm=tm, tn=tn, tk=tk)
    if np_size != n:
        out = out[:n, :n]
    return out


def model_forward_ref(x):
    """Literal translation of the PyTorch add-chain (high-precision matmuls)."""
    mm = lambda a, b: jnp.dot(a, b, precision=jax.lax.Precision.HIGHEST)
    t1 = mm(x, x)
    t2 = mm(x, x)
    t3 = t1 + t2
    t4 = mm(x, x)
    t5 = t1 + t2 + t3 + t4
    t6 = mm(x, x)
    t7 = t5 + t6
    t8 = mm(x, x)
    t9 = t6 + t8
    t10 = t7 + t9
    return t10


if __name__ == "__main__":
    # Small square (the spec uses a tiny matrix; torch.mm(x, x) needs square).
    x1 = jax.random.normal(jax.random.PRNGKey(0), (32, 32), dtype=jnp.float32)
    o1 = model_forward(x1)
    jax.block_until_ready(o1)
    r1 = model_forward_ref(x1)
    assert o1.shape == (32, 32)
    assert jnp.allclose(o1, r1, atol=1e-3, rtol=1e-3), "mismatch (N=32)"

    # Non-aligned small square: single full-array block, no padding needed.
    x2 = jax.random.normal(jax.random.PRNGKey(1), (200, 200), dtype=jnp.float32)
    o2 = model_forward(x2)
    jax.block_until_ready(o2)
    r2 = model_forward_ref(x2)
    assert o2.shape == (200, 200)
    assert jnp.allclose(o2, r2, atol=1e-2, rtol=1e-2), "mismatch (N=200)"

    # Mid size, already lane-aligned: m axis split in two -> grid (2, 1, 1).
    x3 = jax.random.normal(jax.random.PRNGKey(2), (640, 640), dtype=jnp.float32)
    o3 = model_forward(x3)
    jax.block_until_ready(o3)
    r3 = model_forward_ref(x3)
    assert o3.shape == (640, 640)
    assert jnp.allclose(o3, r3, atol=1e-2, rtol=1e-2), "mismatch (N=640)"

    # Non-aligned mid size: pads 600 -> 640 only (not to a full 512 tile).
    x4 = jax.random.normal(jax.random.PRNGKey(3), (600, 600), dtype=jnp.float32)
    o4 = model_forward(x4)
    jax.block_until_ready(o4)
    r4 = model_forward_ref(x4)
    assert o4.shape == (600, 600)
    assert jnp.allclose(o4, r4, atol=1e-2, rtol=1e-2), "mismatch (N=600)"

    # Optional bf16-operand path (MXU-native dtype, f32 accumulation) — looser tol.
    o5 = model_forward(x3, use_bf16=True)
    jax.block_until_ready(o5)
    assert jnp.allclose(o5, r3, atol=2.0, rtol=5e-2), "mismatch (N=640, bf16)"

    print("KERNEL_OK")
</pallas_src>

<mosaic_0001>
module attributes {stable_mosaic.version = 11 : i64} {
  func.func @mm_times8_kernel(%arg0: i32, %arg1: i32, %arg2: i32, %arg3: memref<32x32xf32, #tpu.memory_space<vmem>>, %arg4: memref<32x32xf32, #tpu.memory_space<vmem>>, %arg5: memref<32x32xf32, #tpu.memory_space<vmem>>) attributes {dimension_semantics = [#tpu.dimension_semantics<parallel>, #tpu.dimension_semantics<parallel>, #tpu.dimension_semantics<arbitrary>], iteration_bounds = array<i64: 1, 1, 1>, scalar_prefetch = 0 : i64, scratch_operands = 0 : i64, tpu.core_type = #tpu.core_type<tc>, window_params = [{transform_indices = @transform_0, window_bounds = array<i64: 32, 32>}, {transform_indices = @transform_1, window_bounds = array<i64: 32, 32>}, {transform_indices = @transform_2, window_bounds = array<i64: 32, 32>}]} {
    %c0 = arith.constant 0 : index
    %c0_0 = arith.constant 0 : index
    %0 = vector.load %arg3[%c0, %c0_0] : memref<32x32xf32, #tpu.memory_space<vmem>>, vector<32x32xf32>
    %c0_1 = arith.constant 0 : index
    %c0_2 = arith.constant 0 : index
    %1 = vector.load %arg4[%c0_1, %c0_2] : memref<32x32xf32, #tpu.memory_space<vmem>>, vector<32x32xf32>
    %cst = arith.constant dense<0.000000e+00> : vector<32x32xf32>
    %2 = tpu.matmul %0, %1, %cst {dimension_numbers = #tpu.dot_dimension_numbers<[1], [0], [0], [1], [0, 0, 1, 1], [], []>} : vector<32x32xf32>, vector<32x32xf32>, vector<32x32xf32> -> vector<32x32xf32>
    %c0_i32 = arith.constant 0 : i32
    %3 = arith.cmpi eq, %arg2, %c0_i32 : i32
    %4 = arith.extui %3 : i1 to i32
    %c0_i32_3 = arith.constant 0 : i32
    %5 = arith.cmpi ne, %4, %c0_i32_3 : i32
    scf.if %5 {
      %c0_8 = arith.constant 0 : index
      %c0_9 = arith.constant 0 : index
      %12 = vector.load %arg5[%c0_8, %c0_9] : memref<32x32xf32, #tpu.memory_space<vmem>>, vector<32x32xf32>
      tpu.vector_store %arg5[%c0_8, %c0_9], %2 {strides = array<i32>} : memref<32x32xf32, #tpu.memory_space<vmem>>, vector<32x32xf32>,
    } else {
    }
    %c0_i32_4 = arith.constant 0 : i32
    %6 = arith.cmpi sgt, %arg2, %c0_i32_4 : i32
    %7 = arith.extui %6 : i1 to i32
    %c0_i32_5 = arith.constant 0 : i32
    %8 = arith.cmpi ne, %7, %c0_i32_5 : i32
    scf.if %8 {
      %c0_8 = arith.constant 0 : index
      %c0_9 = arith.constant 0 : index
      %12 = vector.load %arg5[%c0_8, %c0_9] : memref<32x32xf32, #tpu.memory_space<vmem>>, vector<32x32xf32>
      %13 = arith.addf %12, %2 : vector<32x32xf32>
      %c0_10 = arith.constant 0 : index
      %c0_11 = arith.constant 0 : index
      %14 = vector.load %arg5[%c0_10, %c0_11] : memref<32x32xf32, #tpu.memory_space<vmem>>, vector<32x32xf32>
      tpu.vector_store %arg5[%c0_10, %c0_11], %13 {strides = array<i32>} : memref<32x32xf32, #tpu.memory_space<vmem>>, vector<32x32xf32>,
    } else {
    }
    %c0_i32_6 = arith.constant 0 : i32
    %9 = arith.cmpi eq, %arg2, %c0_i32_6 : i32
    %10 = arith.extui %9 : i1 to i32
    %c0_i32_7 = arith.constant 0 : i32
    %11 = arith.cmpi ne, %10, %c0_i32_7 : i32
    scf.if %11 {
      %c0_8 = arith.constant 0 : index
      %c0_9 = arith.constant 0 : index
      %12 = vector.load %arg5[%c0_8, %c0_9] : memref<32x32xf32, #tpu.memory_space<vmem>>, vector<32x32xf32>
      %cst_10 = arith.constant 8.000000e+00 : f32
      %13 = vector.broadcast %cst_10 : f32 to vector<32x32xf32>
      %14 = arith.mulf %12, %13 : vector<32x32xf32>
      %c0_11 = arith.constant 0 : index
      %c0_12 = arith.constant 0 : index
      %15 = vector.load %arg5[%c0_11, %c0_12] : memref<32x32xf32, #tpu.memory_space<vmem>>, vector<32x32xf32>
      tpu.vector_store %arg5[%c0_11, %c0_12], %14 {strides = array<i32>} : memref<32x32xf32, #tpu.memory_space<vmem>>, vector<32x32xf32>,
    } else {
    }
    return
  }
  func.func @transform_0(%arg0: i32, %arg1: i32, %arg2: i32) -> (i32, i32) {
    %c0_i32 = arith.constant 0 : i32
    return %arg0, %arg2 : i32, i32
  }
  func.func @transform_1(%arg0: i32, %arg1: i32, %arg2: i32) -> (i32, i32) {
    %c0_i32 = arith.constant 0 : i32
    return %arg2, %arg1 : i32, i32
  }
  func.func @transform_2(%arg0: i32, %arg1: i32, %arg2: i32) -> (i32, i32) {
    %c0_i32 = arith.constant 0 : i32
    return %arg0, %arg1 : i32, i32
  }
}

</mosaic_0001>

<bundles_post_ra>
// kernel: _mm_times8_call.1
= control target key start
LH: loop header
LB: loop body
LE: loop exit
PB: predicated region body
PF: predicated region fallthrough
CT: control target
= control target key end

     0   :  { %7 = vsyncpa [#allocation3], 0  ;;  %s395_s0 = inlined_call_operand.hbm [shape: f32[32,32], index: 0, kind: input, shape index: {}, may-alias: {0,1}]   ;;  %s396_s1 = inlined_call_operand.hbm [shape: f32[32,32], index: 1, kind: input, shape index: {}, may-alias: {0,1}]   ;;  %s397_s2 = inlined_call_operand.hbm [shape: f32[32,32], index: 2, kind: output, shape index: {}]  }
   0x1   :  { %8 = vsyncpa [#allocation6], 0 }
   0x2   :  { %9 = vsyncpa [#allocation4], 0  ;;  %s318_s9 = smov [#allocation2]   ;;  %s246_s13 = scalar_lea.hbm %s395_s0, 512 }
   0x3   :  { %s15_s10 = sshll.u32 %s318_s9, 4  ;;  %p247_p0 = scmp.ne.s32.totalorder %s395_s0, %s246_s13  ;;  %s16_s10 = int_to_ptr.vmem [resolvable:$true] %s15_s10 }
   0x4   :  { %p250_p1 = scmp.lt.u32.totalorder %s246_s13, %s395_s0 }
   0x6   :  { %p252_p2 = pnand %p250_p1, %p247_p0 }
   0x8   :  { %255 = shalt.err (!%p252_p2)
}
   0x9   :  { %s256_s18 = scalar_lea.vmem %s16_s10, 512  ;;  %p261_p4 = scmp.lt.s32.totalorder %s16_s10, %s16_s10 }
   0xa   :  { %p257_p3 = scmp.ne.s32.totalorder %s16_s10, %s256_s18  ;;  %p262_p5 = scmp.lt.s32.totalorder %s256_s18, %s256_s18 }
   0xc   :  { %p263_p6 = por %p262_p5, %p261_p4 }
   0xe   :  { %p264_p7 = pnand %p263_p6, %p257_p3 }
  0x10   :  { %267 = shalt.err (!%p264_p7)
}
  0x11   :  { %s319_s19 = smov 128   ;;  %s320_s20 = smov 8  }
  0x12   :  { %21 = dma.hbm_to_vmem [thread:$0]  %s395_s0, 512, %s16_s10, [#allocation3], %s319_s19, %s319_s19, %s320_s20  }
  0x13   :  { %s321_s23 = smov [#allocation5]   ;;  %s268_s27 = scalar_lea.hbm %s396_s1, 512 }
  0x14   :  { %s27_s24 = sshll.u32 %s321_s23, 4  ;;  %p269_p8 = scmp.ne.s32.totalorder %s396_s1, %s268_s27  ;;  %s28_s24 = int_to_ptr.vmem [resolvable:$true] %s27_s24 }
  0x15   :  { %p272_p9 = scmp.lt.u32.totalorder %s268_s27, %s396_s1 }
  0x17   :  { %p274_p10 = pnand %p272_p9, %p269_p8 }
  0x19   :  { %277 = shalt.err (!%p274_p10)
}
  0x1a   :  { %s278_s4 = scalar_lea.vmem %s28_s24, 512  ;;  %p283_p12 = scmp.lt.s32.totalorder %s28_s24, %s28_s24 }
  0x1b   :  { %p279_p11 = scmp.ne.s32.totalorder %s28_s24, %s278_s4  ;;  %p284_p13 = scmp.lt.s32.totalorder %s278_s4, %s278_s4 }
  0x1d   :  { %p285_p0 = por %p284_p13, %p283_p12 }
  0x1f   :  { %p286_p1 = pnand %p285_p0, %p279_p11 }
  0x21   :  { %289 = shalt.err (!%p286_p1)
}
  0x22   :  { %33 = dma.hbm_to_vmem [thread:$0]  %s396_s1, 512, %s28_s24, [#allocation6], %s319_s19, %s319_s19, %s320_s20  }
  0x23   :  { %312 = dma.done.wait [#allocation3], 512  }
  0x24   :  { %313 = vsyncadd [#allocation3], 4294966784 }
  0x25   :  { %314 = dma.done.wait [#allocation6], 512  }
  0x26   :  { %315 = vsyncadd [#allocation6], 4294966784  ;;  %vm48_vm0 = vcmask 261120   ;;  %v44_v0 = vld [vmem:[#allocation5] sm:$0xff]  ;;  %v45_v1 = vld [vmem:[#allocation5 + $0x8] sm:$0xff]  ;;  %s322_s1 = smov [#allocation7]  }
  0x27   :  { %v46_v2 = vld [vmem:[#allocation5 + $0x10] sm:$0xff]  ;;  %v229_v3 = vpack.c.bf16 %v45_v1, %v44_v0  ;;  %v47_v4 = vld [vmem:[#allocation5 + $0x18] sm:$0xff]  ;;  %v40_v5 = vld [vmem:[#allocation2] sm:$0xff]  ;;  %s190_s6 = sshll.u32 %s322_s1, 4  ;;  %s191_s6 = int_to_ptr.vmem [resolvable:$true] %s190_s6 }
  0x28   :  { %v42_v6 = vld [vmem:[#allocation2 + $0x10] sm:$0xff]  ;;  %v233_v7 = vpack.c.bf16 %v47_v4, %v46_v2  ;;  %223 = vmatprep.mubr.msk.f32.mxu0 %vm48_vm0, %v40_v5  ;;  %v41_v8 = vld [vmem:[#allocation2 + $0x8] sm:$0xff]  ;;  %v43_v9 = vld [vmem:[#allocation2 + $0x18] sm:$0xff]  ;;  %s290_s7 = scalar_lea.vmem %s191_s6, 512  ;;  %p295_p3 = scmp.lt.s32.totalorder %s191_s6, %s191_s6 }
  0x29   :  { %226 = vmatprep.mubr.msk.f32.mxu1 %vm48_vm0, %v42_v6  ;;  %230 = vmatprep.subr.bf16.mxu0 %v229_v3  ;;  %p291_p2 = scmp.ne.s32.totalorder %s191_s6, %s290_s7  ;;  %p296_p4 = scmp.lt.s32.totalorder %s290_s7, %s290_s7 }
  0x2a   :  { %237 = vmatprep.subr.bf16.mxu1 %v229_v3  ;;  %232 = vmatpush3.bf16.msra.mxu0 %v229_v3 }
  0x2b   :  { %239 = vmatpush3.bf16.msra.mxu1 %v229_v3  ;;  %234 = vmatprep.subr.bf16.mxu0 %v233_v7  ;;  %p297_p5 = por %p296_p4, %p295_p3 }
  0x2c   :  { %238 = vmatprep.subr.bf16.mxu1 %v233_v7 }
  0x2d   :  { %p298_p6 = pnand %p297_p5, %p291_p2 }
  0x2e   :  { %236 = vmatpush3.bf16.msra.mxu0 %v233_v7 }
  0x2f   :  { %240 = vmatpush3.bf16.msra.mxu1 %v233_v7 }
  0x31   :  { %224 = vmatmul.mubr.msk.f32.vlgmr.msra.gmra.mrb[0].mxu0 %vm48_vm0, %v41_v8 }
  0x32   :  { %227 = vmatmul.mubr.msk.f32.vlgmr.msra.gmra.mrb[0].mxu1 %vm48_vm0, %v43_v9 }
 0x104   :  { %v225_v10 = vpop.f32.mrb[0].mxu0 }
 0x105   :  { %v228_v11 = vpop.f32.mrb[0].mxu1  ;;  %151 = vst.msk [vmem:[#allocation7 + $0x8] sm:$0xff] %vm48_vm0, %v225_v10  ;;  %v127_v12 = vpop.f32.mrb[1].mxu0 }
 0x106   :  { %153 = vst.msk [vmem:[#allocation7 + $0x18] sm:$0xff] %vm48_vm0, %v228_v11  ;;  %v137_v13 = vpop.f32.mrb[1].mxu1  ;;  %150 = vst.msk [vmem:[#allocation7] sm:$0xff] %vm48_vm0, %v127_v12 }
 0x107   :  { %152 = vst.msk [vmem:[#allocation7 + $0x10] sm:$0xff] %vm48_vm0, %v137_v13 }
 0x10c   :  { %v174_v14 = vld [vmem:[#allocation7 + $0x8] sm:$0xff] }
 0x10d   :  { %v176_v15 = vld [vmem:[#allocation7 + $0x18] sm:$0xff]  ;;  %v178_v16 = vmul.f32 8.0, %v174_v14  ;;  %v173_v18 = vld [vmem:[#allocation7] sm:$0xff] }
 0x10e   :  { %v180_v17 = vmul.f32 8.0, %v176_v15  ;;  %v175_v19 = vld [vmem:[#allocation7 + $0x10] sm:$0xff]  ;;  %v177_v20 = vmul.f32 8.0, %v173_v18 }
 0x10f   :  { %v179_v21 = vmul.f32 8.0, %v175_v19  ;;  %182 = vst.msk [vmem:[#allocation7 + $0x8] sm:$0xff] %vm48_vm0, %v178_v16 }
 0x110   :  { %184 = vst.msk [vmem:[#allocation7 + $0x18] sm:$0xff] %vm48_vm0, %v180_v17  ;;  %181 = vst.msk [vmem:[#allocation7] sm:$0xff] %vm48_vm0, %v177_v20 }
 0x111   :  { %183 = vst.msk [vmem:[#allocation7 + $0x10] sm:$0xff] %vm48_vm0, %v179_v21 }
 0x112   :  { %301 = shalt.err (!%p298_p6)
}
 0x113   :  { %s302_s10 = scalar_lea.hbm %s397_s2, 512 }
 0x114   :  { %p303_p7 = scmp.ne.s32.totalorder %s397_s2, %s302_s10  ;;  %p306_p8 = scmp.lt.u32.totalorder %s302_s10, %s397_s2 }
 0x116   :  { %p308_p9 = pnand %p306_p8, %p303_p7 }
 0x118   :  { %311 = shalt.err (!%p308_p9)
}
 0x119   :  { %196 = dma.vmem_to_hbm [thread:$0]  %s191_s6, 512, %s397_s2, [#allocation4], %s319_s19, %s319_s19, %s320_s20  }
 0x11a   :  { %316 = dma.done.wait [#allocation4], 512  }
 0x11b   :  { %317 = vsyncadd [#allocation4], 4294966784 }
 0x11c   :  { %200 = vsyncpa [#allocation3], 1 }
 0x11d   :  { %201 = vsyncpa [#allocation6], 1 }
 0x11e   :  { %202 = vsyncpa [#allocation4], 1 }

</bundles_post_ra>
